<compile_context>
chip_gen: v5e
topology: v5e:2x2
jax: 0.10.0
libtpu: 0.0.40
codegen_flags: <defaults>
</compile_context>

<pallas_src>
import jax
import jax.numpy as jnp
import numpy as np
from jax.experimental import pallas as pl
from jax.experimental.pallas import tpu as pltpu

LN_EPS = 1e-5       # nn.LayerNorm default
LIN_ATT_EPS = 1e-6  # LoFTR LinearAttention eps


def _vmem_limit_bytes():
    """Generation-aware scoped-VMEM budget (~75% of physical, capped)."""
    try:
        cap = int(pltpu.get_tpu_info().vmem_capacity_bytes)
    except Exception:
        cap = 64 * 1024 * 1024  # conservative (v7x-sized) fallback
    return max(32 * 1024 * 1024, min(cap * 3 // 4, 96 * 1024 * 1024))


def _layernorm_onepass(y, gamma, beta):
    # Single-pass LN (var = E[y^2] - mu^2): one fewer [TL,C] elementwise pass.
    mu = jnp.mean(y, axis=-1, keepdims=True)
    msq = jnp.mean(y * y, axis=-1, keepdims=True)
    var = jnp.maximum(msq - mu * mu, 0.0)
    return (y - mu) * jax.lax.rsqrt(var + LN_EPS) * gamma + beta


def _elu_p1(z):
    # elu(z) + 1 == z + 1 (z > 0) else exp(z); one EUP exp + VPU add/select.
    return jnp.where(z > 0.0, z + 1.0, jnp.exp(z))


def _pick_tile(n, target):
    """Largest multiple-of-8 divisor of n that is <= target (or n itself)."""
    if n <= target:
        return n
    for t in range(min(target, n), 0, -1):
        if n % t == 0 and t % 8 == 0:
            return t
    # TODO(synk): no suitable divisor; fall back to the untiled axis (may blow
    # the VMEM budget for awkward L/S, especially on v7x's 64 MiB).
    return n


# ---------------------------------------------------------------------------
# Pass 1: per-(batch, split) raw K^T V and Ksum accumulation over S.
# ---------------------------------------------------------------------------
def _make_kv_kernel(compute_dtype):
    def kernel(src_ref, wk_t_ref, wv_t_ref, kv_ref, ksum_ref):
        s_idx = pl.program_id(2)

        @pl.when(s_idx == 0)
        def _():
            kv_ref[...] = jnp.zeros_like(kv_ref)
            ksum_ref[...] = jnp.zeros_like(ksum_ref)

        src = src_ref[...].astype(compute_dtype)                     # [TS, C]
        k = jnp.dot(src, wk_t_ref[...], preferred_element_type=jnp.float32)
        v = jnp.dot(src, wv_t_ref[...], preferred_element_type=jnp.float32)
        K = _elu_p1(k)                                               # f32 [TS, C]

        # K^T @ V, contracted over the S-tile axis (K pre-cast to compute
        # dtype so any relayout stays packed); f32 accumulation in the
        # resident output block.
        kv_ref[...] += jax.lax.dot_general(
            K.astype(compute_dtype), v.astype(compute_dtype),
            dimension_numbers=(((0,), (0,)), ((), ())),
            preferred_element_type=jnp.float32)                      # [C, C]
        ksum_ref[...] += jnp.sum(K, axis=0, keepdims=True)           # [1, C]

    return kernel


# ---------------------------------------------------------------------------
# Pass 2: L-tiled attention consume + merge + LayerNorm1 + MLP + LayerNorm2.
# ---------------------------------------------------------------------------
def _make_attn_kernel(compute_dtype, C, low_precision_mlp, approx_recip):
    mlp_dtype = compute_dtype if low_precision_mlp else jnp.float32

    def kernel(x_ref, kvm_ref, wq_t_ref, wm_t_ref, w1a_t_ref, w1b_t_ref,
               w2_t_ref, g1_ref, b1_ref, g2_ref, b2_ref, o_ref):
        cd = compute_dtype
        x_in = x_ref[...]                                            # [TL, C]
        x_f32 = x_in.astype(jnp.float32)
        x_cd = x_in.astype(cd)

        # q projection + linear-attention feature map (f32 elementwise).
        q = jnp.dot(x_cd, wq_t_ref[...], preferred_element_type=jnp.float32)
        Q = _elu_p1(q).astype(cd)                                    # [TL, C]

        # Single lane-dense matmul against [maskedKV | diag(Ksum)@mask];
        # slice numerator / denominator at the C-lane boundary.
        nd = jnp.dot(Q, kvm_ref[...], preferred_element_type=jnp.float32)
        numer = nd[:, :C]
        denom = nd[:, C:]
        message = numer * pl.reciprocal(denom + LIN_ATT_EPS, approx=approx_recip)

        # merge + norm1 (f32)
        message = jnp.dot(message.astype(cd), wm_t_ref[...],
                          preferred_element_type=jnp.float32)
        message = _layernorm_onepass(message, g1_ref[...], b1_ref[...])

        # MLP on concat([x, message]) without the concat: split w1. The hidden
        # activation optionally stays in compute dtype (bf16 VPU on v6e/v7x).
        h1 = (jnp.dot(x_cd, w1a_t_ref[...], preferred_element_type=mlp_dtype)
              + jnp.dot(message.astype(cd), w1b_t_ref[...],
                        preferred_element_type=mlp_dtype))           # [TL, 2C]
        h1 = jnp.maximum(h1, 0.0)
        message = jnp.dot(h1.astype(cd), w2_t_ref[...],
                          preferred_element_type=jnp.float32)        # [TL, C]
        message = _layernorm_onepass(message, g2_ref[...], b2_ref[...])

        o_ref[...] = (x_f32 + message).astype(o_ref.dtype)

    return kernel


def encoder_layer_pallas(x, source, params, nhead, *,
                         block_l=1024, block_s=1024,
                         compute_dtype=jnp.bfloat16,
                         s_split=1,
                         low_precision_mlp=True,
                         out_dtype=None):
    """Pallas TPU forward of EncoderLayer (linear attention branch).

    s_split: split pass 1's S axis into this many "parallel" chunks (set 2 on
             v7x when N <= 2 so both TensorCores work on the source pass).
    low_precision_mlp: keep the MLP hidden add/ReLU in compute_dtype
             (beneficial on v6e/v7x; set False on v5e which has no bf16 VPU).
    """
    N, L, C = x.shape
    S = source.shape[1]
    dim = C // nhead
    cd = compute_dtype
    approx_recip = (cd != jnp.float32)   # keep the f32 path bit-tight
    out_dtype = x.dtype if out_dtype is None else out_dtype
    vmem_limit = _vmem_limit_bytes()

    if s_split < 1 or S % s_split != 0:
        s_split = 1
    s_chunk = S // s_split

    # Tile sizes (divisors, so no S/L padding corrupts the KV accumulation).
    tl = _pick_tile(L, block_l)
    ts = _pick_tile(s_chunk, block_s)
    n_s_tiles = s_chunk // ts

    # Host-side glue: PyTorch Linear weight is [out, in]; pre-transpose, split
    # w1 into the x / message halves, cast matmul operands to compute dtype.
    wq_t = params["wq"].T.astype(cd)           # [C, C]
    wk_t = params["wk"].T.astype(cd)           # [C, C]
    wv_t = params["wv"].T.astype(cd)           # [C, C]
    wm_t = params["wm"].T.astype(cd)           # [C, C]
    w1_t = params["w1"].T                      # [2C, 2C]
    w1a_t = w1_t[:C].astype(cd)                # [C, 2C]  (acts on x)
    w1b_t = w1_t[C:].astype(cd)                # [C, 2C]  (acts on message)
    w2_t = params["w2"].T.astype(cd)           # [2C, C]
    g1 = params["g1"].reshape(1, C).astype(jnp.float32)
    b1 = params["b1"].reshape(1, C).astype(jnp.float32)
    g2 = params["g2"].reshape(1, C).astype(jnp.float32)
    b2 = params["b2"].reshape(1, C).astype(jnp.float32)

    # Static block-diagonal head mask [C, C]: 1 where channels share a head.
    hid = jnp.arange(C, dtype=jnp.int32) // dim
    head_mask = (hid[:, None] == hid[None, :]).astype(jnp.float32)

    # ---- Pass 1: raw KV / Ksum over the source sequence ----
    kv_parts, ksum_parts = pl.pallas_call(
        _make_kv_kernel(cd),
        out_shape=(jax.ShapeDtypeStruct((N, s_split, C, C), jnp.float32),
                   jax.ShapeDtypeStruct((N, s_split, 1, C), jnp.float32)),
        grid_spec=pltpu.PrefetchScalarGridSpec(
            num_scalar_prefetch=0,
            grid=(N, s_split, n_s_tiles),
            in_specs=[
                pl.BlockSpec((None, ts, C),
                             lambda n, c, s: (n, c * n_s_tiles + s, 0)),  # source
                pl.BlockSpec((C, C), lambda n, c, s: (0, 0)),             # wk_t
                pl.BlockSpec((C, C), lambda n, c, s: (0, 0)),             # wv_t
            ],
            out_specs=(
                pl.BlockSpec((None, None, C, C), lambda n, c, s: (n, c, 0, 0)),
                pl.BlockSpec((None, None, 1, C), lambda n, c, s: (n, c, 0, 0)),
            ),
        ),
        compiler_params=pltpu.CompilerParams(
            dimension_semantics=("parallel", "parallel", "arbitrary"),
            vmem_limit_bytes=vmem_limit),
    )(source, wk_t, wv_t)

    # ---- Tiny host fold (f32, [N,C,*] only): sum split partials, apply the
    # block-diagonal mask, fold Ksum into the mask, emit KVM in compute dtype.
    if s_split > 1:
        kv = kv_parts.sum(axis=1)                                    # [N, C, C]
        ksum = ksum_parts.sum(axis=1)                                # [N, 1, C]
    else:
        kv = kv_parts[:, 0]
        ksum = ksum_parts[:, 0]
    numer_mat = kv * head_mask[None]                                 # masked K^T V
    denom_mat = head_mask[None] * jnp.swapaxes(ksum, 1, 2)           # diag(Ksum) @ mask
    kvm = jnp.concatenate([numer_mat, denom_mat], axis=-1).astype(cd)  # [N, C, 2C]

    const2d = lambda a, b: pl.BlockSpec((a, b), lambda n, l: (0, 0))

    # ---- Pass 2: L-tiled query pass (fully parallel grid) ----
    out = pl.pallas_call(
        _make_attn_kernel(cd, C, low_precision_mlp, approx_recip),
        out_shape=jax.ShapeDtypeStruct((N, L, C), out_dtype),
        grid_spec=pltpu.PrefetchScalarGridSpec(
            num_scalar_prefetch=0,
            grid=(N, L // tl),
            in_specs=[
                pl.BlockSpec((None, tl, C), lambda n, l: (n, l, 0)),     # x
                pl.BlockSpec((None, C, 2 * C), lambda n, l: (n, 0, 0)),  # KVM
                const2d(C, C),                                           # wq_t
                const2d(C, C),                                           # wm_t
                const2d(C, 2 * C),                                       # w1a_t
                const2d(C, 2 * C),                                       # w1b_t
                const2d(2 * C, C),                                       # w2_t
                const2d(1, C),                                           # gamma1
                const2d(1, C),                                           # beta1
                const2d(1, C),                                           # gamma2
                const2d(1, C),                                           # beta2
            ],
            out_specs=pl.BlockSpec((None, tl, C), lambda n, l: (n, l, 0)),
        ),
        compiler_params=pltpu.CompilerParams(
            dimension_semantics=("parallel", "parallel"),
            vmem_limit_bytes=vmem_limit),
    )(x, kvm, wq_t, wm_t, w1a_t, w1b_t, w2_t, g1, b1, g2, b2)
    return out


def _layernorm_ref(y, gamma, beta):
    mu = jnp.mean(y, axis=-1, keepdims=True)
    var = jnp.mean((y - mu) ** 2, axis=-1, keepdims=True)
    return (y - mu) * jax.lax.rsqrt(var + LN_EPS) * gamma + beta


def encoder_layer_reference(x, source, params, nhead):
    """Plain-JAX reference faithful to the PyTorch module (LoFTR linear attn)."""
    N, L, C = x.shape
    S = source.shape[1]
    dim = C // nhead

    q = x @ params["wq"].T
    k = source @ params["wk"].T
    v = source @ params["wv"].T
    q = q.reshape(N, L, nhead, dim)
    k = k.reshape(N, S, nhead, dim)
    v = v.reshape(N, S, nhead, dim)

    Q = jax.nn.elu(q) + 1.0
    K = jax.nn.elu(k) + 1.0
    v_scaled = v / S
    KV = jnp.einsum("nshd,nshv->nhdv", K, v_scaled)
    Z = 1.0 / (jnp.einsum("nlhd,nhd->nlh", Q, K.sum(axis=1)) + LIN_ATT_EPS)
    msg = jnp.einsum("nlhd,nhdv,nlh->nlhv", Q, KV, Z) * S
    msg = msg.reshape(N, L, C) @ params["wm"].T
    msg = _layernorm_ref(msg, params["g1"], params["b1"])
    cat = jnp.concatenate([x, msg], axis=-1)
    h1 = jnp.maximum(cat @ params["w1"].T, 0.0)
    msg = h1 @ params["w2"].T
    msg = _layernorm_ref(msg, params["g2"], params["b2"])
    return x + msg


if __name__ == "__main__":
    # Small smoke-test shapes (production LoFTR: C=256, L/S in the thousands;
    # tune block_l/block_s/s_split there, not at this size).
    N, L, S, d_model, nhead = 2, 64, 64, 32, 4

    key = jax.random.PRNGKey(0)
    keys = jax.random.split(key, 12)
    scale = 0.1
    params = {
        "wq": jax.random.normal(keys[0], (d_model, d_model), jnp.float32) * scale,
        "wk": jax.random.normal(keys[1], (d_model, d_model), jnp.float32) * scale,
        "wv": jax.random.normal(keys[2], (d_model, d_model), jnp.float32) * scale,
        "wm": jax.random.normal(keys[3], (d_model, d_model), jnp.float32) * scale,
        "w1": jax.random.normal(keys[4], (2 * d_model, 2 * d_model), jnp.float32) * scale,
        "w2": jax.random.normal(keys[5], (d_model, 2 * d_model), jnp.float32) * scale,
        "g1": 1.0 + 0.1 * jax.random.normal(keys[6], (d_model,), jnp.float32),
        "b1": 0.1 * jax.random.normal(keys[7], (d_model,), jnp.float32),
        "g2": 1.0 + 0.1 * jax.random.normal(keys[8], (d_model,), jnp.float32),
        "b2": 0.1 * jax.random.normal(keys[9], (d_model,), jnp.float32),
    }
    x = jax.random.normal(keys[10], (N, L, d_model), jnp.float32)
    source = jax.random.normal(keys[11], (N, S, d_model), jnp.float32)

    ref = jax.block_until_ready(encoder_layer_reference(x, source, params, nhead))

    # f32 compute path: tight numerical check (exercises 2x2 L/S tiling).
    out_f32 = jax.block_until_ready(
        encoder_layer_pallas(x, source, params, nhead,
                             block_l=32, block_s=32,
                             compute_dtype=jnp.float32))
    np.testing.assert_allclose(np.asarray(out_f32), np.asarray(ref),
                               rtol=1e-4, atol=1e-4)

    # f32 compute with the pass-1 S megacore split (v7x path): tight check.
    out_split = jax.block_until_ready(
        encoder_layer_pallas(x, source, params, nhead,
                             block_l=32, block_s=32,
                             compute_dtype=jnp.float32, s_split=2))
    np.testing.assert_allclose(np.asarray(out_split), np.asarray(ref),
                               rtol=1e-4, atol=1e-4)

    # bf16-operand performance path (bf16 KVM, bf16 MLP hidden): loose check.
    out_bf16 = jax.block_until_ready(
        encoder_layer_pallas(x, source, params, nhead,
                             block_l=32, block_s=32,
                             compute_dtype=jnp.bfloat16))
    assert bool(jnp.all(jnp.isfinite(out_bf16)))
    np.testing.assert_allclose(np.asarray(out_bf16), np.asarray(ref),
                               rtol=1e-1, atol=1e-1)

    print("KERNEL_OK")
</pallas_src>

<mosaic_0001>
module attributes {stable_mosaic.version = 11 : i64} {
  func.func @kernel(%arg0: i32, %arg1: i32, %arg2: i32, %arg3: memref<1x32x32xf32, #tpu.memory_space<vmem>>, %arg4: memref<32x32xf32, #tpu.memory_space<vmem>>, %arg5: memref<32x32xf32, #tpu.memory_space<vmem>>, %arg6: memref<1x1x32x32xf32, #tpu.memory_space<vmem>>, %arg7: memref<1x1x1x32xf32, #tpu.memory_space<vmem>>) attributes {dimension_semantics = [#tpu.dimension_semantics<parallel>, #tpu.dimension_semantics<parallel>, #tpu.dimension_semantics<arbitrary>], iteration_bounds = array<i64: 2, 1, 2>, scalar_prefetch = 0 : i64, scratch_operands = 0 : i64, tpu.core_type = #tpu.core_type<tc>, window_params = [{transform_indices = @transform_0, window_bounds = array<i64: 1, 32, 32>}, {pipeline_mode = #tpu.pipeline_mode<synchronous>, transform_indices = @transform_1, window_bounds = array<i64: 32, 32>}, {pipeline_mode = #tpu.pipeline_mode<synchronous>, transform_indices = @transform_2, window_bounds = array<i64: 32, 32>}, {transform_indices = @transform_3, window_bounds = array<i64: 1, 1, 32, 32>}, {transform_indices = @transform_4, window_bounds = array<i64: 1, 1, 1, 32>}]} {
    %c0_i32 = arith.constant 0 : i32
    %0 = arith.cmpi eq, %arg2, %c0_i32 : i32
    %1 = arith.extui %0 : i1 to i32
    %c0_i32_0 = arith.constant 0 : i32
    %2 = arith.cmpi ne, %1, %c0_i32_0 : i32
    scf.if %2 {
      %cst_28 = arith.constant 0.000000e+00 : f32
      %30 = vector.broadcast %cst_28 : f32 to vector<32x32xf32>
      %c0_29 = arith.constant 0 : index
      %c0_30 = arith.constant 0 : index
      %c0_31 = arith.constant 0 : index
      %c0_32 = arith.constant 0 : index
      %31 = vector.load %arg6[%c0_29, %c0_30, %c0_31, %c0_32] : memref<1x1x32x32xf32, #tpu.memory_space<vmem>>, vector<1x1x32x32xf32>
      %32 = vector.shape_cast %31 : vector<1x1x32x32xf32> to vector<32x32xf32>
      %33 = vector.shape_cast %30 : vector<32x32xf32> to vector<1x1x32x32xf32>
      tpu.vector_store %arg6[%c0_29, %c0_30, %c0_31, %c0_32], %33 {strides = array<i32>} : memref<1x1x32x32xf32, #tpu.memory_space<vmem>>, vector<1x1x32x32xf32>,
      %cst_33 = arith.constant 0.000000e+00 : f32
      %34 = vector.broadcast %cst_33 : f32 to vector<1x32xf32>
      %c0_34 = arith.constant 0 : index
      %c0_35 = arith.constant 0 : index
      %c0_36 = arith.constant 0 : index
      %c0_37 = arith.constant 0 : index
      %35 = vector.load %arg7[%c0_34, %c0_35, %c0_36, %c0_37] : memref<1x1x1x32xf32, #tpu.memory_space<vmem>>, vector<1x1x1x32xf32>
      %36 = vector.shape_cast %35 : vector<1x1x1x32xf32> to vector<1x32xf32>
      %37 = vector.shape_cast %34 : vector<1x32xf32> to vector<1x1x1x32xf32>
      tpu.vector_store %arg7[%c0_34, %c0_35, %c0_36, %c0_37], %37 {strides = array<i32>} : memref<1x1x1x32xf32, #tpu.memory_space<vmem>>, vector<1x1x1x32xf32>,
    } else {
    }
    %c0 = arith.constant 0 : index
    %c0_1 = arith.constant 0 : index
    %c0_2 = arith.constant 0 : index
    %3 = vector.load %arg3[%c0, %c0_1, %c0_2] : memref<1x32x32xf32, #tpu.memory_space<vmem>>, vector<1x32x32xf32>
    %4 = vector.shape_cast %3 : vector<1x32x32xf32> to vector<32x32xf32>
    %c0_3 = arith.constant 0 : index
    %c0_4 = arith.constant 0 : index
    %5 = vector.load %arg4[%c0_3, %c0_4] : memref<32x32xf32, #tpu.memory_space<vmem>>, vector<32x32xf32>
    %cst = arith.constant dense<0.000000e+00> : vector<32x32xf32>
    %6 = tpu.matmul %4, %5, %cst {dimension_numbers = #tpu.dot_dimension_numbers<[1], [0], [0], [1], [0, 0, 1, 1], [], []>} : vector<32x32xf32>, vector<32x32xf32>, vector<32x32xf32> -> vector<32x32xf32>
    %c0_5 = arith.constant 0 : index
    %c0_6 = arith.constant 0 : index
    %7 = vector.load %arg5[%c0_5, %c0_6] : memref<32x32xf32, #tpu.memory_space<vmem>>, vector<32x32xf32>
    %cst_7 = arith.constant dense<0.000000e+00> : vector<32x32xf32>
    %8 = tpu.matmul %4, %7, %cst_7 {dimension_numbers = #tpu.dot_dimension_numbers<[1], [0], [0], [1], [0, 0, 1, 1], [], []>} : vector<32x32xf32>, vector<32x32xf32>, vector<32x32xf32> -> vector<32x32xf32>
    %cst_8 = arith.constant 0.000000e+00 : f32
    %9 = vector.broadcast %cst_8 : f32 to vector<32x32xf32>
    %10 = arith.cmpf ogt, %6, %9 : vector<32x32xf32>
    %cst_9 = arith.constant 1.000000e+00 : f32
    %11 = vector.broadcast %cst_9 : f32 to vector<32x32xf32>
    %12 = arith.addf %6, %11 : vector<32x32xf32>
    %13 = math.exp %6 : vector<32x32xf32>
    %14 = arith.select %10, %12, %13 : vector<32x32xi1>, vector<32x32xf32>
    %c0_10 = arith.constant 0 : index
    %c0_11 = arith.constant 0 : index
    %c0_12 = arith.constant 0 : index
    %c0_13 = arith.constant 0 : index
    %15 = vector.load %arg6[%c0_10, %c0_11, %c0_12, %c0_13] : memref<1x1x32x32xf32, #tpu.memory_space<vmem>>, vector<1x1x32x32xf32>
    %16 = vector.shape_cast %15 : vector<1x1x32x32xf32> to vector<32x32xf32>
    %cst_14 = arith.constant dense<0.000000e+00> : vector<32x32xf32>
    %17 = tpu.matmul %14, %8, %cst_14 {dimension_numbers = #tpu.dot_dimension_numbers<[0], [0], [1], [1], [0, 1, 1, 1], [], []>} : vector<32x32xf32>, vector<32x32xf32>, vector<32x32xf32> -> vector<32x32xf32>
    %18 = arith.addf %16, %17 : vector<32x32xf32>
    %c0_15 = arith.constant 0 : index
    %c0_16 = arith.constant 0 : index
    %c0_17 = arith.constant 0 : index
    %c0_18 = arith.constant 0 : index
    %19 = vector.load %arg6[%c0_15, %c0_16, %c0_17, %c0_18] : memref<1x1x32x32xf32, #tpu.memory_space<vmem>>, vector<1x1x32x32xf32>
    %20 = vector.shape_cast %19 : vector<1x1x32x32xf32> to vector<32x32xf32>
    %21 = vector.shape_cast %18 : vector<32x32xf32> to vector<1x1x32x32xf32>
    tpu.vector_store %arg6[%c0_15, %c0_16, %c0_17, %c0_18], %21 {strides = array<i32>} : memref<1x1x32x32xf32, #tpu.memory_space<vmem>>, vector<1x1x32x32xf32>,
    %c0_19 = arith.constant 0 : index
    %c0_20 = arith.constant 0 : index
    %c0_21 = arith.constant 0 : index
    %c0_22 = arith.constant 0 : index
    %22 = vector.load %arg7[%c0_19, %c0_20, %c0_21, %c0_22] : memref<1x1x1x32xf32, #tpu.memory_space<vmem>>, vector<1x1x1x32xf32>
    %23 = vector.shape_cast %22 : vector<1x1x1x32xf32> to vector<1x32xf32>
    %cst_23 = arith.constant dense<0.000000e+00> : vector<32xf32>
    %24 = vector.multi_reduction <add>, %14, %cst_23 [0] : vector<32x32xf32> to vector<32xf32>
    %25 = vector.shape_cast %24 : vector<32xf32> to vector<1x32xf32>
    %26 = arith.addf %23, %25 : vector<1x32xf32>
    %c0_24 = arith.constant 0 : index
    %c0_25 = arith.constant 0 : index
    %c0_26 = arith.constant 0 : index
    %c0_27 = arith.constant 0 : index
    %27 = vector.load %arg7[%c0_24, %c0_25, %c0_26, %c0_27] : memref<1x1x1x32xf32, #tpu.memory_space<vmem>>, vector<1x1x1x32xf32>
    %28 = vector.shape_cast %27 : vector<1x1x1x32xf32> to vector<1x32xf32>
    %29 = vector.shape_cast %26 : vector<1x32xf32> to vector<1x1x1x32xf32>
    tpu.vector_store %arg7[%c0_24, %c0_25, %c0_26, %c0_27], %29 {strides = array<i32>} : memref<1x1x1x32xf32, #tpu.memory_space<vmem>>, vector<1x1x1x32xf32>,
    return
  }
  func.func @transform_0(%arg0: i32, %arg1: i32, %arg2: i32) -> (i32, i32, i32) {
    %c2_i32 = arith.constant 2 : i32
    %0 = arith.muli %arg1, %c2_i32 : i32
    %1 = arith.addi %0, %arg2 : i32
    %c0_i32 = arith.constant 0 : i32
    %c0_i32_0 = arith.constant 0 : i32
    return %arg0, %1, %c0_i32 : i32, i32, i32
  }
  func.func @transform_1(%arg0: i32, %arg1: i32, %arg2: i32) -> (i32, i32) {
    %c0_i32 = arith.constant 0 : i32
    %c0_i32_0 = arith.constant 0 : i32
    %c0_i32_1 = arith.constant 0 : i32
    return %c0_i32, %c0_i32_0 : i32, i32
  }
  func.func @transform_2(%arg0: i32, %arg1: i32, %arg2: i32) -> (i32, i32) {
    %c0_i32 = arith.constant 0 : i32
    %c0_i32_0 = arith.constant 0 : i32
    %c0_i32_1 = arith.constant 0 : i32
    return %c0_i32, %c0_i32_0 : i32, i32
  }
  func.func @transform_3(%arg0: i32, %arg1: i32, %arg2: i32) -> (i32, i32, i32, i32) {
    %c0_i32 = arith.constant 0 : i32
    %c0_i32_0 = arith.constant 0 : i32
    %c0_i32_1 = arith.constant 0 : i32
    return %arg0, %arg1, %c0_i32, %c0_i32_0 : i32, i32, i32, i32
  }
  func.func @transform_4(%arg0: i32, %arg1: i32, %arg2: i32) -> (i32, i32, i32, i32) {
    %c0_i32 = arith.constant 0 : i32
    %c0_i32_0 = arith.constant 0 : i32
    %c0_i32_1 = arith.constant 0 : i32
    return %arg0, %arg1, %c0_i32, %c0_i32_0 : i32, i32, i32, i32
  }
}

</mosaic_0001>

<bundles_post_ra>
// kernel: tpu_custom_call.1
= control target key start
LH: loop header
LB: loop body
LE: loop exit
PB: predicated region body
PF: predicated region fallthrough
CT: control target
= control target key end

     0   :  { %s1119_s0 = inlined_call_operand.vmem [shape: f32[2,64,32], index: 0, kind: input, shape index: {}]   ;;  %s1120_s1 = inlined_call_operand.vmem [shape: f32[32,32], index: 1, kind: input, shape index: {}]   ;;  %s1121_s2 = inlined_call_operand.vmem [shape: f32[32,32], index: 2, kind: input, shape index: {}]   ;;  %s1122_s3 = inlined_call_operand.hbm [shape: f32[2,1,32,32], index: 3, kind: output, shape index: {0}]   ;;  %s1123_s4 = inlined_call_operand.hbm [shape: f32[2,1,1,32], index: 4, kind: output, shape index: {1}]  }
   0x1   :  { %1124 = sst [smem:[#allocation8_spill]] %s1119_s0 }
   0x2   :  { %1125 = sst [smem:[#allocation9_spill]] %s1120_s1 }
   0x3   :  { %10 = vsyncpa [#allocation3], 0 }
   0x4   :  { %12 = vsyncpa [#allocation3 + $0x1], 0 }
   0x5   :  { %13 = vsyncpa [#allocation5], 0 }
   0x6   :  { %15 = vsyncpa [#allocation5 + $0x1], 0  ;;  %s909_s15 = smov 0   ;;  %s911_s16 = smov 0  }
   0x7   :  { %s913_s17 = smov 0   ;;  %s915_s18 = smov 0  }
   0x8   :  { %s917_s19 = smov 0   ;;  %s919_s20 = smov 0  }
   0x9   :  { %s921_s21 = smov 0   ;;  %s923_s22 = smov 0  }
   0xa LB: > { %s625_s23 = sadd.s32 4294967295, %s879_s22   ;;  %s626_s24 = sadd.s32 4294967294, %s879_s22   ;;  %s879_s22 = sphi %s923_s22, %s21_s22   ;;  %s875_s21 = sphi %s921_s21, %s1136_s21   ;;  %s871_s20 = sphi %s919_s20, %s1135_s20   ;;  %s867_s19 = sphi %s917_s19, %s1134_s19   ;;  %s863_s18 = sphi %s915_s18, %s1133_s18   ;;  %s859_s17 = sphi %s913_s17, %s1132_s17   ;;  %s855_s16 = sphi %s911_s16, %s1131_s16   ;;  %s851_s15 = sphi %s909_s15, %s1130_s15  }
   0xb   : > { %s33_s25 = sadd.s32 1, %s871_s20  ;;  %s40_s26 = sadd.s32 1, %s875_s21 }
   0xc   : > { %p34_p0 = scmp.ge.s32.totalorder %s33_s25, 2  ;;  %p133_p1 = scmp.ne.s32.totalorder %s859_s17, %s855_s16 }
   0xd   : > { %p134_p2 = scmp.eq.s32.totalorder %s625_s23, 3  ;;  %p139_p4 = scmp.ne.s32.totalorder %s855_s16, %s851_s15 }
   0xe   : > { %s1138_s25 = smov (%p34_p0, %s33_s25), 0  ;;  %s1140_s26 = smov (!%p34_p0, %s40_s26), %s875_s21 }
   0xf   : > { %p958_p3 = por %p134_p2, %p133_p1  ;;  %p42_p5 = scmp.ge.s32.totalorder %s1140_s26, 2 }
  0x10   : > { %p140_p6 = scmp.eq.s32.totalorder %s626_s24, 3  ;;  %p629_p7 = scmp.ge.s32.totalorder %s879_s22, 1 }
  0x11   : > { %p209_p8 = scmp.lt.s32.totalorder %s879_s22, 5  ;;  %s1142_s26 = smov (%p42_p5, %s1140_s26), 0 }
  0x12   : > { %p968_p9 = por %p140_p6, %p139_p4  ;;  %s118_s29 = ssub.s32 %s875_s21, %s1142_s26 }
  0x13   : > { %p210_p10 = pnand %p629_p7, %p209_p8  ;;  %s123_s30 = sadd.s32 1, %s859_s17 }
  0x14   : > { %p121_p11 = scmp.eq.s32.totalorder %s118_s29, 0  ;;  %s979_s6 = sand.u32 (!%p210_p10), 1, %s855_s16  }
  0x15   : > { %213 = sbr.rel (%p210_p10) target bundleno = 517 (0x205), region = 32  ;;  %s631_s7 = sshll.u32 (!%p210_p10), %s863_s18, 2 }
  0x16   : > { %s976_s5 = scalar_select %p121_p11, %s859_s17, %s123_s30  }
  0x17   : > { %s630_s8 = sshll.u32 (!%p210_p10), %s979_s6, 5  ;;  %p248_p12 = scmp.lt.s32.totalorder (!%p210_p10), %s867_s19, 1 }
  0x18   : > { %p250_p13 = scmp.lt.s32.totalorder (!%p210_p10), %s631_s7, 7  ;;  %s1128_s0 = sld [smem:[#allocation8_spill]] (!%p210_p10) }
  0x19   : > { %s990_s24 = scalar_lea.vmem (!%p210_p10), [#allocation2], %s630_s8  ;;  %s993_s29 = scalar_lea.vmem (!%p210_p10), [#allocation4], %s979_s6 }
  0x1a   : > { %s249_s9 = scalar_select %p248_p12, %s867_s19, 1 }
  0x1b   : > { %s1144_s7 = smov (!%p250_p13, %s631_s7), 7  ;;  %p634_p0 = scmp.ne.s32.totalorder %s863_s18, 0 }
  0x1c   : > { %s632_s10 = sshll.u32 %s249_s9, 3 }
  0x1d   : > { %s253_s11 = sadd.s32 %s632_s10, %s1144_s7  ;;  %262 = sbr.rel (%p634_p0) target bundleno = 40 (0x28), region = 36 }
  0x1e   : > { %s633_s12 = sshll.u32 %s253_s11, 3 }
  0x1f   : > { %s988_s23 = scalar_lea.vmem %s1128_s0, %s633_s12 }
  0x22   : > { %vm263_vm0 = vcmask 261120   ;;  %v881_v0 = vmov 0.0   ;;  %vm268_vm1 = vcmask 253952  }
  0x23   : > { %264 = vst.msk [vmem:[%s990_s24] sm:$0xff] %vm263_vm0, %v881_v0 }
  0x24   : > { %265 = vst.msk [vmem:[%s990_s24 + $0x8] sm:$0xff] %vm263_vm0, %v881_v0 }
  0x25   : > { %266 = vst.msk [vmem:[%s990_s24 + $0x10] sm:$0xff] %vm263_vm0, %v881_v0 }
  0x26   : > { %267 = vst.msk [vmem:[%s990_s24 + $0x18] sm:$0xff] %vm263_vm0, %v881_v0 }
  0x27   : > { %269 = vst.msk [vmem:[%s993_s29] sm:$0x1] %vm268_vm1, %v881_v0 }
  0x28 PF: > { %s1129_s1 = sld [smem:[#allocation9_spill]]  ;;  %v270_v5 = vld [vmem:[%s988_s23] sm:$0xff]  ;;  %vm278_vm2 = vcmask 261120   ;;  %v271_v6 = vld [vmem:[%s988_s23 + $0x8] sm:$0xff]  ;;  %v272_v7 = vld [vmem:[%s988_s23 + $0x10] sm:$0xff]  ;;  %vm473_vm7 = vcmask 253952   ;;  %s509_s12 = scalar_lea.hbm %s1123_s4, %s867_s19 }
  0x29   : > { %v273_v8 = vld [vmem:[%s988_s23 + $0x18] sm:$0xff]  ;;  %v322_v10 = vld [vmem:[%s1121_s2 + $0x10] sm:$0xff]  ;;  %v321_v11 = vld [vmem:[%s1121_s2 + $0x8] sm:$0xff]  ;;  %s511_s13 = sshll.u32 %s993_s29, 4  ;;  %s513_s14 = sshll.u32 %s509_s12, 4  ;;  %s512_s13 = int_to_ptr.vmem [resolvable:$true] %s511_s13  ;;  %s514_s14 = int_to_ptr.hbm [resolvable:$true] %s513_s14 }
  0x2a   : > { %v323_v9 = vld [vmem:[%s1121_s2 + $0x18] sm:$0xff]  ;;  %v320_v12 = vld [vmem:[%s1121_s2] sm:$0xff]  ;;  %s481_s30 = scalar_lea.sflag [#allocation5], %s979_s6  ;;  %s767_s7 = sshra.s32 %s514_s14, 4  ;;  %s768_s7 = int_to_ptr.hbm [resolvable:$true] %s767_s7 }
  0x2b   : > { %657 = vmatpush.msra.mxu1 %v323_v9  ;;  %s769_s18 = scalar_lea.hbm %s768_s7, 1  ;;  %s773_s9 = scalar_lea.hbm %s1123_s4, 2 }
  0x2c   : > { %p770_p1 = scmp.ne.s32.totalorder %s768_s7, %s769_s18  ;;  %p774_p5 = scmp.lt.s32.totalorder %s768_s7, %s1123_s4 }
  0x2d   : > { %658 = vmatpush.msra.mxu1 %v322_v10  ;;  %p775_p6 = scmp.lt.s32.totalorder %s773_s9, %s769_s18 }
  0x2e   : > { %v277_v1 = vld [vmem:[%s1129_s1 + $0x18] sm:$0xff]  ;;  %v276_v2 = vld [vmem:[%s1129_s1 + $0x10] sm:$0xff]  ;;  %v275_v3 = vld [vmem:[%s1129_s1 + $0x8] sm:$0xff]  ;;  %p771_p2 = pnand %p770_p1, %p958_p3 }
  0x2f   : > { %303 = vmatpush.msra.mxu0 %v277_v1  ;;  %653 = vmatpush.msra.mxu3 %v277_v1  ;;  %v274_v4 = vld [vmem:[%s1129_s1] sm:$0xff]  ;;  %p776_p7 = por %p775_p6, %p774_p5 }
  0x30   : > { %659 = vmatpush.msra.mxu1 %v321_v11  ;;  %v458_v45 = vld [vmem:[%s993_s29] sm:$0x1]  ;;  %p772_p4 = pneg %p771_p2 }
  0x31   : > { %304 = vmatpush.msra.mxu0 %v276_v2  ;;  %654 = vmatpush.msra.mxu3 %v276_v2 }
  0x32   : > { %660 = vmatpush.msra.mxu1 %v320_v12  ;;  %p777_p8 = pnand %p776_p7, %p772_p4 }
  0x33   : > { %305 = vmatpush.msra.mxu0 %v275_v3  ;;  %655 = vmatpush.msra.mxu3 %v275_v3 }
  0x34   : > { %640 = vmatmul.msk.f32.vlgmr.msra.gmra.mxu1 %vm278_vm2, %v271_v6 }
  0x35   : > { %306 = vmatpush.msra.mxu0 %v274_v4  ;;  %656 = vmatpush.msra.mxu3 %v274_v4 }
  0x36   : > { %635 = vmatmul.msk.f32.vlgmr.msra.gmra.mxu0 %vm278_vm2, %v270_v5  ;;  %636 = vmatmul.msk.f32.vlgmr.msra.gmra.mxu3 %vm278_vm2, %v271_v6 }
  0x37   : > { %336 = vmatpush.msrb.mxu0 %v323_v9 }
  0x39   : > { %337 = vmatpush.msrb.mxu0 %v322_v10 }
  0x3b   : > { %338 = vmatpush.msrb.mxu0 %v321_v11 }
  0x3c   : > { %641 = vmatmul.msk.f32.gmra.mxu1 %vm278_vm2, %v272_v7 }
  0x3d   : > { %339 = vmatpush.msrb.mxu0 %v320_v12 }
  0x3e   : > { %637 = vmatmul.msk.f32.gmra.mxu3 %vm278_vm2, %v272_v7  ;;  %639 = vmatmul.msk.f32.vlgmr.msrb.gmra.mxu0 %vm278_vm2, %v270_v5 }
  0x44   : > { %642 = vmatmul.msk.f32.gmra.mxu1 %vm278_vm2, %v273_v8 }
  0x46   : > { %638 = vmatmul.msk.f32.gmra.mxu3 %vm278_vm2, %v273_v8 }
  0xb1   : > { %v344_v48 = vpop.f32.mrf.mxu1 }
  0xb3   : > { %v308_v13 = vpop.f32.mrf.mxu0 }
  0xb4   : > { %v361_v14 = vmul.f32 1.442695, %v308_v13  ;;  %v357_v17 = vadd.f32 1.0, %v308_v13  ;;  %vm353_vm3 = vcmp.gt.f32.partialorder %v308_v13, 0.0 }
  0xb6   : > { %745 = vpow2.f32 %v361_v14 }
  0xb9   : > { %v311_v15 = vpop.f32.mrf.mxu3  ;;  %v347_v49 = vpop.f32.mrf.mxu1 }
  0xba   : > { %v363_v16 = vmul.f32 1.442695, %v311_v15  ;;  %v358_v23 = vadd.f32 1.0, %v311_v15  ;;  %vm354_vm4 = vcmp.gt.f32.partialorder %v311_v15, 0.0 }
  0xbb   : > { %v341_v51 = vpop.f32.mrf.mxu0 }
  0xbc   : > { %v746_v18 = vpop.eup %745  ;;  %747 = vpow2.f32 %v363_v16 }
  0xbd   : > { %v369_v19 = vsel %vm353_vm3, %v357_v17, %v746_v18 }
  0xbe   : > { %377 = vxpose.xlu0.b32.start [1/4] (short) (narrow) %v369_v19, 32  ;;  %v459_v31 = vsel %vm278_vm2, %v369_v19, 0.0 }
  0xc1   : > { %v314_v20 = vpop.f32.mrf.mxu3  ;;  %v350_v50 = vpop.f32.mrf.mxu1 }
  0xc2   : > { %v748_v21 = vpop.eup %747  ;;  %v365_v22 = vmul.f32 1.442695, %v314_v20  ;;  %v359_v28 = vadd.f32 1.0, %v314_v20  ;;  %vm355_vm5 = vcmp.gt.f32.partialorder %v314_v20, 0.0  ;;  %433 = vmatpush.msra.mxu0 %v350_v50  ;;  %661 = vmatpush.msra.mxu2 %v350_v50 }
  0xc3   : > { %v370_v24 = vsel %vm354_vm4, %v358_v23, %v748_v21 }
  0xc4   : > { %749 = vpow2.f32 %v365_v22  ;;  %v460_v30 = vsel %vm278_vm2, %v370_v24, 0.0  ;;  %434 = vmatpush.msra.mxu0 %v347_v49  ;;  %662 = vmatpush.msra.mxu2 %v347_v49 }
  0xc5   : > { %v461_v33 = vadd.f32 %v460_v30, %v459_v31 }
  0xc6   : > { %378 = vxpose.xlu0.b32.cont [2/4] (short) (narrow) %v370_v24, 32  ;;  %435 = vmatpush.msra.mxu0 %v344_v48 }
  0xc7   : > { %663 = vmatpush.msra.mxu2 %v344_v48 }
  0xc8   : > { %436 = vmatpush.msra.mxu0 %v341_v51 }
  0xc9   : > { %v317_v25 = vpop.f32.mrf.mxu3  ;;  %664 = vmatpush.msra.mxu2 %v341_v51 }
  0xca   : > { %v750_v26 = vpop.eup %749  ;;  %v367_v27 = vmul.f32 1.442695, %v317_v25  ;;  %v360_v34 = vadd.f32 1.0, %v317_v25  ;;  %vm356_vm6 = vcmp.gt.f32.partialorder %v317_v25, 0.0 }
  0xcb   : > { %v371_v29 = vsel %vm355_vm5, %v359_v28, %v750_v26 }
  0xcc   : > { %751 = vpow2.f32 %v367_v27  ;;  %v462_v32 = vsel %vm278_vm2, %v371_v29, 0.0 }
  0xcd   : > { %v463_v36 = vadd.f32 %v462_v32, %v461_v33 }
  0xce   : > { %379 = vxpose.xlu0.b32.cont [3/4] (short) (narrow) %v371_v29, 32 }
  0xd2   : > { %v752_v35 = vpop.eup %751 }
  0xd3   : > { %v372_v37 = vsel %vm356_vm6, %v360_v34, %v752_v35 }
  0xd4   : > { %v464_v38 = vsel %vm278_vm2, %v372_v37, 0.0 }
  0xd5   : > { %v465_v39 = vadd.f32 %v464_v38, %v463_v36 }
  0xd6   : > { %380 = vxpose.xlu0.b32.end [4/4] (short) (narrow) %v372_v37, 32 }
  0xd7   : > { %v466_v40 = vrot.slane %v465_v39, 4 }
  0xd9   : > { %v467_v41 = vadd.f32 %v466_v40, %v465_v39 }
  0xdb   : > { %v468_v42 = vrot.slane %v467_v41, 2 }
  0xdd   : > { %v469_v43 = vadd.f32 %v468_v42, %v467_v41 }
  0xdf   : > { %v470_v44 = vrot.slane %v469_v43, 1 }
  0xe1   : > { %v471_v46 = vadd.f32 %v470_v44, %v469_v43 }
  0xe3   : > { %v472_v47 = vadd.f32 %v471_v46, %v458_v45 }
  0xe5   : > { %474 = vst.msk [vmem:[%s993_s29] sm:$0x1] %vm473_vm7, %v472_v47 }
 0x162   : > { %v393_v52 = vpop.trf.xlu0 }
 0x163   : > { %643 = vmatmul.msk.f32.vlgmr.msra.gmra.mxu0 %vm278_vm2, %v393_v52 }
 0x16a   : > { %v394_v53 = vpop.trf.xlu0 }
 0x16b   : > { %644 = vmatmul.msk.f32.vlgmr.msra.gmra.mxu2 %vm278_vm2, %v394_v53 }
 0x172   : > { %v395_v54 = vpop.trf.xlu0 }
 0x173   : > { %645 = vmatmul.msk.f32.gmra.mxu2 %vm278_vm2, %v395_v54 }
 0x17a   : > { %v396_v55 = vpop.trf.xlu0 }
 0x17b   : > { %646 = vmatmul.msk.f32.gmra.mxu2 %vm278_vm2, %v396_v55 }
 0x17c   : > { %780 = shalt.err (!%p777_p8)
}
 0x17d   : > { %666 = dma.vmem_to_hbm [thread:$0]  (%p958_p3), %s512_s13, 16, %s514_s14, %s481_s30   ;;  %v373_v56 = vld [vmem:[%s990_s24] sm:$0xff]  ;;  %v374_v59 = vld [vmem:[%s990_s24 + $0x8] sm:$0xff]  ;;  %v375_v62 = vld [vmem:[%s990_s24 + $0x10] sm:$0xff] }
 0x17e   : > { %s652_s0 = sshll.u32 %s867_s19, 5  ;;  %s494_s11 = sshll.u32 %s990_s24, 4  ;;  %v376_v1 = vld [vmem:[%s990_s24 + $0x18] sm:$0xff]  ;;  %s495_s11 = int_to_ptr.vmem [resolvable:$true] %s494_s11 }
 0x17f   : > { %s493_s10 = scalar_lea.hbm %s1122_s3, %s652_s0  ;;  %s476_s13 = scalar_lea.sflag [#allocation3], %s979_s6 }
 0x180   : > { %s496_s12 = sshll.u32 %s493_s10, 4  ;;  %s801_s18 = scalar_lea.hbm %s1122_s3, 64  ;;  %s497_s12 = int_to_ptr.hbm [resolvable:$true] %s496_s12 }
 0x181   : > { %s795_s19 = sshra.s32 %s497_s12, 4  ;;  %s796_s19 = int_to_ptr.hbm [resolvable:$true] %s795_s19 }
 0x182   : > { %s797_s14 = scalar_lea.hbm %s796_s19, 32  ;;  %p802_p13 = scmp.lt.s32.totalorder %s796_s19, %s1122_s3 }
 0x183   : > { %p798_p10 = scmp.ne.s32.totalorder %s796_s19, %s797_s14  ;;  %p803_p0 = scmp.lt.s32.totalorder %s801_s18, %s797_s14 }
 0x185   : > { %p799_p11 = pnand %p798_p10, %p958_p3  ;;  %p804_p1 = por %p803_p0, %p802_p13 }
 0x187   : > { %p800_p12 = pneg %p799_p11 }
 0x189   : > { %p805_p2 = pnand %p804_p1, %p800_p12 }
 0x1e0   : > { %v438_v57 = vpop.f32.mrf.mxu0 }
 0x1e1   : > { %v450_v58 = vadd.f32 %v438_v57, %v373_v56 }
 0x1e3   : > { %454 = vst.msk [vmem:[%s990_s24] sm:$0xff] %vm278_vm2, %v450_v58 }
 0x1ee   : > { %v441_v60 = vpop.f32.mrf.mxu2 }
 0x1ef   : > { %v451_v61 = vadd.f32 %v441_v60, %v374_v59 }
 0x1f1   : > { %455 = vst.msk [vmem:[%s990_s24 + $0x8] sm:$0xff] %vm278_vm2, %v451_v61 }
 0x1f6   : > { %v444_v63 = vpop.f32.mrf.mxu2 }
 0x1f7   : > { %v452_v0 = vadd.f32 %v444_v63, %v375_v62 }
 0x1f9   : > { %456 = vst.msk [vmem:[%s990_s24 + $0x10] sm:$0xff] %vm278_vm2, %v452_v0 }
 0x1fe   : > { %v447_v2 = vpop.f32.mrf.mxu2 }
 0x1ff   : > { %v453_v3 = vadd.f32 %v447_v2, %v376_v1 }
 0x201   : > { %457 = vst.msk [vmem:[%s990_s24 + $0x18] sm:$0xff] %vm278_vm2, %v453_v3 }
 0x202   : > { %808 = shalt.err (!%p805_p2)
}
 0x203   : > { %s882_s6 = smov 128   ;;  %s883_s24 = smov 8  }
 0x204   : > { %665 = dma.vmem_to_hbm [thread:$0]  (%p958_p3), %s495_s11, 512, %s497_s12, %s476_s13, %s882_s6, %s882_s6, %s883_s24  }
 0x205 PF: > { %p676_p4 = scmp.ge.s32.totalorder %s879_s22, 2  ;;  %s525_s9 = sand.u32 1, %s851_s15  }
 0x206   : > { %s526_s0 = scalar_lea.sflag [#allocation3], %s525_s9 }
 0x207   : > { %p670_p5 = pnand %p676_p4, %p968_p9 }
 0x209   : > { %p671_p6 = pneg %p670_p5 }
 0x20b   : > { %842 = dma.done.wait (%p671_p6), %s526_s0, 512  }
 0x20c   : > { %844 = vsyncadd (%p671_p6), %s526_s0, 4294966784  ;;  %s536_s1 = scalar_lea.sflag [#allocation5], %s525_s9 }
 0x20d   : > { %846 = dma.done.wait (%p671_p6), %s536_s1, 16  }
 0x20e   : > { %848 = vsyncadd (%p671_p6), %s536_s1, 4294967280  ;;  %s21_s22 = sadd.s32 1, %s879_s22   ;;  %s1130_s15 = smov %s855_s16 }
 0x20f   : > { %p18_p7 = scmp.ge.s32.totalorder %s21_s22, 6   ;;  %s1131_s16 = smov %s859_s17 }
 0x210   : > { %s1132_s17 = smov %s976_s5  ;;  %s1133_s18 = smov %s871_s20 }
 0x211   : > { %s1134_s19 = smov %s875_s21  ;;  %s1135_s20 = smov %s1138_s25 }
 0x212   : > { %s1136_s21 = smov %s1142_s26  ;;  %20 = sbr.rel (!%p18_p7) target bundleno = 10 (0xa), region = 88 }
 0x217   :  { %541 = vsyncpa [#allocation3], 1 }
 0x218   :  { %543 = vsyncpa [#allocation3 + $0x1], 1 }
 0x219   :  { %544 = vsyncpa [#allocation5], 1 }
 0x21a   :  { %546 = vsyncpa [#allocation5 + $0x1], 1 }

</bundles_post_ra>
